<compile_context>
chip_gen: v7x
topology: tpu7x:2x2x1
jax: 0.10.0
libtpu: 0.0.40
codegen_flags: <defaults>
</compile_context>

<pallas_src>
import math

import jax
import jax.numpy as jnp
from jax.experimental import pallas as pl
from jax.experimental.pallas import tpu as pltpu

_LANE = 128


def _gelu_kernel(x_ref, o_ref):
    # Elementwise tanh-GELU on the current VMEM tile (VPU + one EUP tanh).
    x = x_ref[...]
    xf = x.astype(jnp.float32)
    c = jnp.float32(math.sqrt(2.0 / math.pi))
    k = jnp.float32(0.044715)
    half = jnp.float32(0.5)
    one = jnp.float32(1.0)
    # x + 0.044715*x^3 == x * (1 + 0.044715*x^2): one fewer VPU multiply.
    inner = c * xf * (one + k * (xf * xf))
    y = half * xf * (one + jnp.tanh(inner))
    o_ref[...] = y.astype(o_ref.dtype)


def gelu(x, *, target_tile_bytes=8 * 1024 * 1024, vmem_limit_bytes=48 * 1024 * 1024):
    """Tanh-approximation GELU via Pallas. Accepts any shape; elementwise."""
    orig_shape = x.shape
    dtype = x.dtype
    itemsize = jnp.dtype(dtype).itemsize
    # Sublane quantum for this dtype: 8 (f32) / 16 (bf16) / 32 (int8, fp8).
    sub = 8 * max(1, 4 // itemsize)
    n = x.size
    if n == 0:
        return x

    last = orig_shape[-1] if x.ndim >= 2 else n
    # Keep the original trailing dim as the lane axis only if it is already
    # 128-aligned AND a minimal (sub x last) tile still fits the byte budget.
    keep_last = (
        x.ndim >= 2
        and last % _LANE == 0
        and last * itemsize * sub <= target_tile_bytes
    )

    if keep_last:
        cols = last
        x2d = x.reshape(-1, cols)
        pad = 0
    else:
        # Lane-dense re-slab: flatten and use a wide, 128-aligned lane axis
        # (up to 1024 lanes), padding the tail if needed. GELU(0) == 0, and
        # the pad is sliced off afterwards anyway.
        cols = _LANE * max(1, min(8, pl.cdiv(n, _LANE * 8)))
        rows_pad = pl.cdiv(n, cols)
        pad = rows_pad * cols - n
        xf = x.reshape(-1)
        if pad:
            xf = jnp.pad(xf, (0, pad))
        x2d = xf.reshape(rows_pad, cols)

    rows = x2d.shape[0]

    # Budget-driven row tile (~target_tile_bytes per buffer), sublane-aligned.
    tm = max(sub, (target_tile_bytes // (cols * itemsize)) // sub * sub)
    if tm >= rows:
        if rows >= 2 * sub:
            # Split so a dual-TensorCore chip (v7x) gets >= 2 parallel blocks.
            tm = sub * pl.cdiv(pl.cdiv(rows, 2), sub)
        else:
            tm = rows  # full-array block (always a legal block shape)
    grid = (pl.cdiv(rows, tm),)

    out2d = pl.pallas_call(
        _gelu_kernel,
        out_shape=jax.ShapeDtypeStruct((rows, cols), dtype),
        grid_spec=pltpu.PrefetchScalarGridSpec(
            num_scalar_prefetch=0,
            grid=grid,
            in_specs=[pl.BlockSpec((tm, cols), lambda i: (i, 0))],
            out_specs=pl.BlockSpec((tm, cols), lambda i: (i, 0)),
        ),
        compiler_params=pltpu.CompilerParams(
            dimension_semantics=("parallel",),
            vmem_limit_bytes=vmem_limit_bytes,
        ),
    )(x2d)

    if keep_last:
        return out2d.reshape(orig_shape)
    out_flat = out2d.reshape(-1)
    if pad:
        out_flat = out_flat[:n]
    return out_flat.reshape(orig_shape)


def _gelu_ref(x):
    # Pure-JAX reference matching the PyTorch module exactly.
    xf = x.astype(jnp.float32)
    y = 0.5 * xf * (1.0 + jnp.tanh(jnp.sqrt(2.0 / jnp.pi) * (xf + 0.044715 * xf ** 3)))
    return y.astype(x.dtype)


if __name__ == "__main__":
    key = jax.random.PRNGKey(0)

    # GPT-2-style small shape: [batch=2, seq=8, hidden=32] (exercises the
    # lane-dense re-slab path, since 32 < 128).
    x = jax.random.normal(key, (2, 8, 32), dtype=jnp.float32)
    y = gelu(x)
    jax.block_until_ready(y)
    assert y.shape == x.shape and y.dtype == x.dtype
    assert jnp.allclose(y, _gelu_ref(x), atol=1e-6, rtol=1e-6)

    # 1-D vector with a non-128-multiple length (exercises the padding path).
    x1 = jax.random.normal(jax.random.PRNGKey(1), (1000,), dtype=jnp.float32)
    y1 = gelu(x1)
    jax.block_until_ready(y1)
    assert y1.shape == x1.shape and y1.dtype == x1.dtype
    assert jnp.allclose(y1, _gelu_ref(x1), atol=1e-6, rtol=1e-6)

    # 128-aligned trailing dim (exercises the keep-last fast path), bf16.
    x2 = jax.random.normal(jax.random.PRNGKey(2), (2, 8, 256), dtype=jnp.bfloat16)
    y2 = gelu(x2)
    jax.block_until_ready(y2)
    assert y2.shape == x2.shape and y2.dtype == x2.dtype
    assert jnp.allclose(
        y2.astype(jnp.float32), _gelu_ref(x2).astype(jnp.float32), atol=2e-2, rtol=2e-2
    )

    print("KERNEL_OK")
</pallas_src>

<mosaic_0001>
module attributes {stable_mosaic.version = 11 : i64} {
  func.func @_gelu_kernel(%arg0: i32, %arg1: memref<4x128xf32, #tpu.memory_space<vmem>>, %arg2: memref<4x128xf32, #tpu.memory_space<vmem>>) attributes {dimension_semantics = [#tpu.dimension_semantics<parallel>], iteration_bounds = array<i64: 1>, scalar_prefetch = 0 : i64, scratch_operands = 0 : i64, tpu.core_type = #tpu.core_type<tc>, window_params = [{transform_indices = @transform_0, window_bounds = array<i64: 4, 128>}, {transform_indices = @transform_1, window_bounds = array<i64: 4, 128>}]} {
    %c0 = arith.constant 0 : index
    %c0_0 = arith.constant 0 : index
    %0 = vector.load %arg1[%c0, %c0_0] : memref<4x128xf32, #tpu.memory_space<vmem>>, vector<4x128xf32>
    %cst = arith.constant 0.797884583 : f32
    %1 = vector.broadcast %cst : f32 to vector<4x128xf32>
    %2 = arith.mulf %1, %0 : vector<4x128xf32>
    %3 = arith.mulf %0, %0 : vector<4x128xf32>
    %cst_1 = arith.constant 4.471500e-02 : f32
    %4 = vector.broadcast %cst_1 : f32 to vector<4x128xf32>
    %5 = arith.mulf %4, %3 : vector<4x128xf32>
    %cst_2 = arith.constant 1.000000e+00 : f32
    %6 = vector.broadcast %cst_2 : f32 to vector<4x128xf32>
    %7 = arith.addf %6, %5 : vector<4x128xf32>
    %8 = arith.mulf %2, %7 : vector<4x128xf32>
    %cst_3 = arith.constant 5.000000e-01 : f32
    %9 = vector.broadcast %cst_3 : f32 to vector<4x128xf32>
    %10 = arith.mulf %9, %0 : vector<4x128xf32>
    %11 = math.tanh %8 : vector<4x128xf32>
    %cst_4 = arith.constant 1.000000e+00 : f32
    %12 = vector.broadcast %cst_4 : f32 to vector<4x128xf32>
    %13 = arith.addf %12, %11 : vector<4x128xf32>
    %14 = arith.mulf %10, %13 : vector<4x128xf32>
    %c0_5 = arith.constant 0 : index
    %c0_6 = arith.constant 0 : index
    %15 = vector.load %arg2[%c0_5, %c0_6] : memref<4x128xf32, #tpu.memory_space<vmem>>, vector<4x128xf32>
    tpu.vector_store %arg2[%c0_5, %c0_6], %14 {strides = array<i32>} : memref<4x128xf32, #tpu.memory_space<vmem>>, vector<4x128xf32>,
    return
  }
  func.func @transform_0(%arg0: i32) -> (i32, i32) {
    %c0_i32 = arith.constant 0 : i32
    %c0_i32_0 = arith.constant 0 : i32
    return %arg0, %c0_i32 : i32, i32
  }
  func.func @transform_1(%arg0: i32) -> (i32, i32) {
    %c0_i32 = arith.constant 0 : i32
    %c0_i32_0 = arith.constant 0 : i32
    return %arg0, %c0_i32 : i32, i32
  }
}

</mosaic_0001>

<bundles_post_ra>
// kernel: tpu_custom_call.1
= control target key start
LH: loop header
LB: loop body
LE: loop exit
PB: predicated region body
PF: predicated region fallthrough
CT: control target
= control target key end

     0   :  { %6 = vsyncpa [#allocation3], 0  ;;  %s135_s0 = inlined_call_operand.hbm [shape: f32[4,128], index: 0, kind: input, shape index: {}]   ;;  %s136_s1 = inlined_call_operand.hbm [shape: f32[4,128], index: 1, kind: output, shape index: {}]  }
   0x1   :  { %7 = vsyncpa [#allocation4], 0  ;;  %s99_s6 = smov [#allocation2]   ;;  %s51_s10 = scalar_lea.hbm %s135_s0, 64 }
   0x2   :  { %s14_s7 = sshll.u32 %s99_s6, 4  ;;  %p52_p0 = scmp.ne.s32.totalorder %s135_s0, %s51_s10  ;;  %s15_s7 = int_to_ptr.vmem [resolvable:$true] %s14_s7 }
   0x3   :  { %p55_p1 = scmp.lt.u32.totalorder %s51_s10, %s135_s0 }
   0x5   :  { %p57_p2 = pnand %p55_p1, %p52_p0 }
   0x7   :  { %60 = shalt.err (!%p57_p2)
}
   0x8   :  { %s61_s15 = scalar_lea.vmem %s15_s7, 64  ;;  %p66_p4 = scmp.lt.s32.totalorder %s15_s7, %s15_s7 }
   0x9   :  { %p62_p3 = scmp.ne.s32.totalorder %s15_s7, %s61_s15  ;;  %p67_p5 = scmp.lt.s32.totalorder %s61_s15, %s61_s15 }
   0xb   :  { %p68_p6 = por %p67_p5, %p66_p4 }
   0xd   :  { %p69_p7 = pnand %p68_p6, %p62_p3 }
   0xf   :  { %72 = shalt.err (!%p69_p7)
}
  0x10   :  { %17 = dma.hbm_to_vmem [thread:$0]  %s135_s0, 64, %s15_s7, [#allocation3]  }
  0x11   :  { %95 = dma.done.wait [#allocation3], 64  }
  0x12   :  { %96 = vsyncadd [#allocation3], 4294967232  ;;  %v21_v0 = vld [vmem:[#allocation2] sm:$0xf]  ;;  %s100_s18 = smov [#allocation5]  }
  0x13   :  { %v23_v1 = vmul.f32 %v21_v0, %v21_v0  ;;  %v22_v2 = vmul.f32 0.7978846, %v21_v0  ;;  %v27_v6 = vmul.f32 0.5, %v21_v0  ;;  %s38_s19 = sshll.u32 %s100_s18, 4  ;;  %s39_s19 = int_to_ptr.vmem [resolvable:$true] %s38_s19 }
  0x14   :  { %s73_s20 = scalar_lea.vmem %s39_s19, 64  ;;  %p78_p9 = scmp.lt.s32.totalorder %s39_s19, %s39_s19 }
  0x15   :  { %v24_v3 = vmul.f32 0.044715, %v23_v1  ;;  %p74_p8 = scmp.ne.s32.totalorder %s39_s19, %s73_s20  ;;  %p79_p10 = scmp.lt.s32.totalorder %s73_s20, %s73_s20 }
  0x17   :  { %v25_v4 = vadd.f32 1.0, %v24_v3  ;;  %p80_p11 = por %p79_p10, %p78_p9 }
  0x19   :  { %v26_v5 = vmul.f32 %v25_v4, %v22_v2  ;;  %p81_p12 = pnand %p80_p11, %p74_p8 }
  0x1b   :  { %49 = vtanh.f32 %v26_v5 }
  0x25   :  { %v50_v7 = vpop.eup %49 }
  0x26   :  { %v29_v8 = vadd.f32 1.0, %v50_v7 }
  0x28   :  { %v30_v9 = vmul.f32 %v29_v8, %v27_v6 }
  0x2a   :  { %31 = vst [vmem:[#allocation5] sm:$0xf] %v30_v9 }
  0x2b   :  { %84 = shalt.err (!%p81_p12)
}
  0x2c   :  { %s85_s22 = scalar_lea.hbm %s136_s1, 64 }
  0x2d   :  { %p86_p13 = scmp.ne.s32.totalorder %s136_s1, %s85_s22  ;;  %p89_p0 = scmp.lt.u32.totalorder %s85_s22, %s136_s1 }
  0x2f   :  { %p91_p1 = pnand %p89_p0, %p86_p13 }
  0x31   :  { %94 = shalt.err (!%p91_p1)
}
  0x32   :  { %41 = dma.vmem_to_hbm [thread:$0]  %s39_s19, 64, %s136_s1, [#allocation4]  }
  0x33   :  { %97 = dma.done.wait [#allocation4], 64  }
  0x34   :  { %98 = vsyncadd [#allocation4], 4294967232 }
  0x35   :  { %45 = vsyncpa [#allocation3], 1 }
  0x36   :  { %46 = vsyncpa [#allocation4], 1 }

</bundles_post_ra>
